<compile_context>
chip_gen: v7x
topology: tpu7x:2x2x1
jax: 0.10.0
libtpu: 0.0.40
codegen_flags: <defaults>
</compile_context>

<pallas_src>
import functools

import jax
import jax.numpy as jnp
from jax.experimental import pallas as pl
from jax.experimental.pallas import tpu as pltpu


def _sepconv_kernel(x_ref, w_ref, b_ref, o_ref, *, kernel_size, l_out):
    # x_ref : (1, C_in, L)       one batch element, PyTorch layout (C on sublanes)
    # w_ref : (C_out, K*C_in)    fused depthwise*pointwise weights
    # b_ref : (C_out, 1)         fused bias (broadcasts over the lane axis)
    # o_ref : (1, C_out, L_out)  PyTorch output layout (L_out on lanes)
    x = x_ref[0]                                                # (C_in, L)

    # im2col along the sublane axis: row k*C_in + c == x[c, k : k + L_out].
    # K is small and static, so this is a single concat of lane-shifted views.
    x_col = jnp.concatenate(
        [x[:, k:k + l_out] for k in range(kernel_size)], axis=0)  # (K*C_in, L_out)

    # One fused MXU contraction: (C_out, K*C_in) @ (K*C_in, L_out).
    out = jnp.dot(w_ref[...], x_col,
                  preferred_element_type=jnp.float32) + b_ref[...]
    o_ref[0] = out.astype(o_ref.dtype)


def separable_conv1d(x_ncl, dw_weight, dw_bias, pw_weight, pw_bias,
                     depth_multiplier):
    """x_ncl: (N, C_in, L)  -- PyTorch layout.
    dw_weight: (C_in*dm, 1, K), dw_bias: (C_in*dm,)
    pw_weight: (C_out, C_in*dm, 1), pw_bias: (C_out,)
    returns (N, C_out, L-K+1) -- PyTorch layout."""
    n, c_in, length = x_ncl.shape
    c_mid, _, k = dw_weight.shape
    c_out = pw_weight.shape[0]
    assert c_mid == c_in * depth_multiplier
    assert length >= k, "valid (padding=0) conv requires length >= kernel_size"
    l_out = length - k + 1

    # --- weight-side fusion (tiny tensors, done once outside the kernel) ----
    #   W[o, k*C_in + c] = sum_m dw[c*dm+m, 0, k] * pw[o, c*dm+m, 0]
    #   b[o]             = sum_j pw[o, j, 0] * dw_bias[j] + pw_bias[o]
    wd = dw_weight[:, 0, :].astype(jnp.float32)                 # (C_mid, K)
    wd = wd.reshape(c_in, depth_multiplier, k)                  # (C_in, dm, K)
    wp2 = pw_weight[:, :, 0].astype(jnp.float32)                # (C_out, C_mid)
    wp = wp2.T.reshape(c_in, depth_multiplier, c_out)           # (C_in, dm, C_out)
    w_fused = jnp.einsum("cmk,cmo->okc", wd, wp)                # (C_out, K, C_in)
    w_fused = w_fused.reshape(c_out, k * c_in)                  # (C_out, K*C_in)
    b_fused = (dw_bias.astype(jnp.float32) @ wp2.T
               + pw_bias.astype(jnp.float32)).reshape(c_out, 1)

    kernel = functools.partial(_sepconv_kernel, kernel_size=k, l_out=l_out)

    # TODO(synk): for long sequences add an L grid axis with a K-1 halo
    # (element-offset index_map) and size the L tile against v7x's 64 MiB
    # physical / v5e's 16 MiB scoped VMEM (set vmem_limit_bytes); unnecessary
    # at these sizes -- each per-batch block fits in a couple of vregs.
    return pl.pallas_call(
        kernel,
        out_shape=jax.ShapeDtypeStruct((n, c_out, l_out), x_ncl.dtype),
        grid=(n,),
        in_specs=[
            pl.BlockSpec((1, c_in, length), lambda i: (i, 0, 0)),
            pl.BlockSpec((c_out, k * c_in), lambda i: (0, 0)),
            pl.BlockSpec((c_out, 1), lambda i: (0, 0)),
        ],
        out_specs=pl.BlockSpec((1, c_out, l_out), lambda i: (i, 0, 0)),
        compiler_params=pltpu.CompilerParams(
            dimension_semantics=("parallel",)),
    )(x_ncl, w_fused, b_fused)


def _reference(x_ncl, dw_weight, dw_bias, pw_weight, pw_bias, depth_multiplier):
    """Pure-JAX reference matching PyTorch Conv1d semantics (unfused)."""
    n, c_in, length = x_ncl.shape
    c_mid, _, k = dw_weight.shape
    c_out = pw_weight.shape[0]
    l_out = length - k + 1
    # depthwise (groups=in_channels, depth_multiplier outputs per group)
    dw = jnp.zeros((n, c_mid, l_out), jnp.float32)
    for j in range(c_mid):
        src = j // depth_multiplier
        acc = jnp.zeros((n, l_out), jnp.float32)
        for kk in range(k):
            acc = acc + x_ncl[:, src, kk:kk + l_out] * dw_weight[j, 0, kk]
        dw = dw.at[:, j, :].set(acc + dw_bias[j])
    # pointwise
    out = jnp.einsum("ncl,oc->nol", dw, pw_weight[:, :, 0]) + pw_bias[None, :, None]
    return out.astype(x_ncl.dtype)


if __name__ == "__main__":
    # Small shapes implied by the module: batch=2, in_channels=4, length=16,
    # kernel_size=3, depth_multiplier=2, out_channels=8.
    N, C_IN, L = 2, 4, 16
    K, DM, C_OUT = 3, 2, 8
    C_MID = C_IN * DM

    key = jax.random.PRNGKey(0)
    k1, k2, k3, k4, k5 = jax.random.split(key, 5)
    x = jax.random.normal(k1, (N, C_IN, L), dtype=jnp.float32)
    dw_weight = jax.random.normal(k2, (C_MID, 1, K), dtype=jnp.float32) * 0.3
    dw_bias = jax.random.normal(k3, (C_MID,), dtype=jnp.float32) * 0.1
    pw_weight = jax.random.normal(k4, (C_OUT, C_MID, 1), dtype=jnp.float32) * 0.3
    pw_bias = jax.random.normal(k5, (C_OUT,), dtype=jnp.float32) * 0.1

    out = separable_conv1d(x, dw_weight, dw_bias, pw_weight, pw_bias, DM)
    out = jax.block_until_ready(out)

    ref = _reference(x, dw_weight, dw_bias, pw_weight, pw_bias, DM)
    assert out.shape == (N, C_OUT, L - K + 1), out.shape
    assert jnp.allclose(out, ref, atol=1e-4, rtol=1e-4), \
        float(jnp.max(jnp.abs(out - ref)))

    print("KERNEL_OK")
</pallas_src>

<mosaic_0001>
module attributes {stable_mosaic.version = 11 : i64} {
  func.func @_sepconv_kernel(%arg0: i32, %arg1: memref<1x4x16xf32, #tpu.memory_space<vmem>>, %arg2: memref<8x12xf32, #tpu.memory_space<vmem>>, %arg3: memref<8x1xf32, #tpu.memory_space<vmem>>, %arg4: memref<1x8x14xf32, #tpu.memory_space<vmem>>) attributes {dimension_semantics = [#tpu.dimension_semantics<parallel>], iteration_bounds = array<i64: 2>, scalar_prefetch = 0 : i64, scratch_operands = 0 : i64, tpu.core_type = #tpu.core_type<tc>, window_params = [{transform_indices = @transform_0, window_bounds = array<i64: 1, 4, 16>}, {pipeline_mode = #tpu.pipeline_mode<synchronous>, transform_indices = @transform_1, window_bounds = array<i64: 8, 12>}, {pipeline_mode = #tpu.pipeline_mode<synchronous>, transform_indices = @transform_2, window_bounds = array<i64: 8, 1>}, {transform_indices = @transform_3, window_bounds = array<i64: 1, 8, 14>}]} {
    %c0 = arith.constant 0 : index
    %c0_0 = arith.constant 0 : index
    %c0_1 = arith.constant 0 : index
    %0 = vector.load %arg1[%c0, %c0_0, %c0_1] : memref<1x4x16xf32, #tpu.memory_space<vmem>>, vector<1x4x16xf32>
    %1 = vector.shape_cast %0 : vector<1x4x16xf32> to vector<4x16xf32>
    %2 = vector.extract_strided_slice %1 {offsets = [0, 0], sizes = [4, 14], strides = [1, 1]} : vector<4x16xf32> to vector<4x14xf32>
    %3 = vector.extract_strided_slice %1 {offsets = [0, 1], sizes = [4, 14], strides = [1, 1]} : vector<4x16xf32> to vector<4x14xf32>
    %4 = vector.extract_strided_slice %1 {offsets = [0, 2], sizes = [4, 14], strides = [1, 1]} : vector<4x16xf32> to vector<4x14xf32>
    %5 = tpu.concatenate %2, %3, %4 in 0 : vector<4x14xf32>, vector<4x14xf32>, vector<4x14xf32> -> vector<12x14xf32>
    %c0_2 = arith.constant 0 : index
    %c0_3 = arith.constant 0 : index
    %6 = vector.load %arg2[%c0_2, %c0_3] : memref<8x12xf32, #tpu.memory_space<vmem>>, vector<8x12xf32>
    %cst = arith.constant dense<0.000000e+00> : vector<8x14xf32>
    %7 = tpu.matmul %6, %5, %cst {dimension_numbers = #tpu.dot_dimension_numbers<[1], [0], [0], [1], [0, 0, 1, 1], [], []>} : vector<8x12xf32>, vector<12x14xf32>, vector<8x14xf32> -> vector<8x14xf32>
    %c0_4 = arith.constant 0 : index
    %c0_5 = arith.constant 0 : index
    %8 = vector.load %arg3[%c0_4, %c0_5] : memref<8x1xf32, #tpu.memory_space<vmem>>, vector<8x1xf32>
    %9 = vector.broadcast %8 : vector<8x1xf32> to vector<8x14xf32>
    %10 = arith.addf %7, %9 : vector<8x14xf32>
    %c0_6 = arith.constant 0 : index
    %c0_7 = arith.constant 0 : index
    %c0_8 = arith.constant 0 : index
    %11 = vector.load %arg4[%c0_6, %c0_7, %c0_8] : memref<1x8x14xf32, #tpu.memory_space<vmem>>, vector<1x8x14xf32>
    %12 = vector.shape_cast %11 : vector<1x8x14xf32> to vector<8x14xf32>
    %13 = vector.shape_cast %10 : vector<8x14xf32> to vector<1x8x14xf32>
    tpu.vector_store %arg4[%c0_6, %c0_7, %c0_8], %13 {strides = array<i32>} : memref<1x8x14xf32, #tpu.memory_space<vmem>>, vector<1x8x14xf32>,
    return
  }
  func.func @transform_0(%arg0: i32) -> (i32, i32, i32) {
    %c0_i32 = arith.constant 0 : i32
    %c0_i32_0 = arith.constant 0 : i32
    %c0_i32_1 = arith.constant 0 : i32
    return %arg0, %c0_i32, %c0_i32_0 : i32, i32, i32
  }
  func.func @transform_1(%arg0: i32) -> (i32, i32) {
    %c0_i32 = arith.constant 0 : i32
    %c0_i32_0 = arith.constant 0 : i32
    %c0_i32_1 = arith.constant 0 : i32
    return %c0_i32, %c0_i32_0 : i32, i32
  }
  func.func @transform_2(%arg0: i32) -> (i32, i32) {
    %c0_i32 = arith.constant 0 : i32
    %c0_i32_0 = arith.constant 0 : i32
    %c0_i32_1 = arith.constant 0 : i32
    return %c0_i32, %c0_i32_0 : i32, i32
  }
  func.func @transform_3(%arg0: i32) -> (i32, i32, i32) {
    %c0_i32 = arith.constant 0 : i32
    %c0_i32_0 = arith.constant 0 : i32
    %c0_i32_1 = arith.constant 0 : i32
    return %arg0, %c0_i32, %c0_i32_0 : i32, i32, i32
  }
}

</mosaic_0001>

<bundles_post_ra>
// kernel: tpu_custom_call.1
= control target key start
LH: loop header
LB: loop body
LE: loop exit
PB: predicated region body
PF: predicated region fallthrough
CT: control target
= control target key end

     0   :  { %8 = vsyncpa [#allocation3], 0  ;;  %s709_s0 = inlined_call_operand.vmem [shape: f32[2,4,16], index: 0, kind: input, shape index: {}]   ;;  %s710_s1 = inlined_call_operand.hbm [shape: f32[8,12], index: 1, kind: input, shape index: {}]   ;;  %s711_s2 = inlined_call_operand.vmem [shape: f32[8,1], index: 2, kind: input, shape index: {}]   ;;  %s712_s3 = inlined_call_operand.hbm [shape: f32[2,8,14], index: 3, kind: output, shape index: {}]  }
   0x1   :  { %9 = vsyncpa [#allocation4], 0 }
   0x2   :  { %11 = vsyncpa [#allocation4 + $0x1], 0  ;;  %s571_s12 = smov 0   ;;  %s573_s13 = smov 0  }
   0x3   :  { %s575_s14 = smov 0   ;;  %s577_s15 = smov 0  }
   0x4 LB: > { %s592_s16 = sadd.s32 4294967295, %s540_s15   ;;  %s359_s17 = sadd.s32 4294967294, %s540_s15   ;;  %s540_s15 = sphi %s577_s15, %s728_s15   ;;  %s536_s14 = sphi %s575_s14, %s727_s14   ;;  %s532_s13 = sphi %s573_s13, %s726_s13   ;;  %s528_s12 = sphi %s571_s12, %s725_s12  }
   0x5   : > { %s596_s18 = sadd.s32 1, %s540_s15   ;;  %s92_s19 = sadd.s32 1, %s536_s14 }
   0x6   : > { %s89_s20 = ssub.s32 %s540_s15, %s596_s18  ;;  %p102_p0 = scmp.ne.s32.totalorder %s536_s14, %s532_s13 }
   0x7   : > { %p90_p1 = scmp.eq.s32.totalorder %s89_s20, 0  ;;  %p103_p2 = scmp.eq.s32.totalorder %s592_s16, 1 }
   0x8   : > { %p108_p3 = scmp.ne.s32.totalorder %s532_s13, %s528_s12  ;;  %p109_p4 = scmp.eq.s32.totalorder %s359_s17, 1 }
   0x9   : > { %s607_s21 = scalar_select %p90_p1, %s536_s14, %s92_s19  }
   0xa   : > { %p609_p5 = por %p103_p2, %p102_p0  ;;  %p613_p6 = por %p109_p4, %p108_p3 }
   0xb   : > { %p360_p7 = scmp.ge.s32.totalorder %s540_s15, 1  ;;  %p116_p8 = scmp.lt.s32.totalorder %s540_s15, 3 }
   0xc   : > { %s716_s22 = scalar_select %p609_p5, 1, 0 }
   0xd   : > { %s717_s23 = scalar_select %p613_p6, 1, 0 }
   0xe   : > { %p713_p9 = scmp.eq.s32.totalorder %s592_s16, 0  ;;  %p620_p10 = pnand %p360_p7, %p116_p8 }
   0xf   : > { %s542_s25 = smov [#allocation2]   ;;  %s446_s30 = scalar_lea.hbm %s710_s1, 128 }
  0x10   : > { %s718_s24 = scalar_select %p620_p10, 1, 0 }
  0x11   : > { %s129_s26 = sshll.u32 %s542_s25, 4  ;;  %p393_p11 = pneg %p620_p10  ;;  %s130_s26 = int_to_ptr.vmem [resolvable:$true] %s129_s26 }
  0x12   : > { %p447_p13 = scmp.ne.s32.totalorder %s710_s1, %s446_s30  ;;  %p453_p3 = scmp.lt.u32.totalorder %s446_s30, %s710_s1 }
  0x13   : > { %p628_p12 = pnand %p713_p9, %p393_p11 }
  0x15   : > { %p448_p0 = pneg %p628_p12 }
  0x17   : > { %p449_p1 = pnand %p448_p0, %p447_p13 }
  0x19   : > { %p450_p2 = pneg %p449_p1 }
  0x1b   : > { %p455_p4 = pnand %p453_p3, %p450_p2 }
  0x1d   : > { %458 = shalt.err (!%p455_p4)
}
  0x1e   : > { %s459_s8 = scalar_lea.vmem %s130_s26, 128  ;;  %p467_p9 = scmp.lt.s32.totalorder %s130_s26, %s130_s26 }
  0x1f   : > { %p460_p7 = scmp.ne.s32.totalorder %s130_s26, %s459_s8  ;;  %p468_p6 = scmp.lt.s32.totalorder %s459_s8, %s459_s8 }
  0x21   : > { %p462_p8 = pnand %p460_p7, %p448_p0  ;;  %p469_p5 = por %p468_p6, %p467_p9 }
  0x23   : > { %p463_p11 = pneg %p462_p8 }
  0x25   : > { %p470_p10 = pnand %p469_p5, %p463_p11 }
  0x27   : > { %473 = shalt.err (!%p470_p10)
}
  0x28   : > { %396 = dma.hbm_to_vmem [thread:$0]  (!%p628_p12), %s710_s1, 128, %s130_s26, [#allocation3]  }
  0x29   : > { %p720_p13 = scmp.ne.s32.totalorder %s718_s24, 0 }
  0x2a   : > { %p721_p1 = scmp.eq.s32.totalorder (!%p720_p13), %s592_s16, 0 }
  0x2b   : > { %152 = sbr.rel (%p720_p13) target bundleno = 412 (0x19c), region = 32 }
  0x32   : > { %519 = dma.done.wait (%p721_p1), [#allocation3], 128   ;;  %p722_p0 = pmov %p721_p1 }
  0x33   : > { %p175_p6 = scmp.lt.s32.totalorder %s592_s16, 1  ;;  %v543_v0 = vmov 0.0|0.0   ;;  %vm544_vm0 = vmmov 0   ;;  %v545_v1 = vmov 0.0   ;;  %v546_v3 = vmov 0   ;;  %v190_v4 = vld [vmem:[%s711_s2] sm:$0xff] }
  0x34   : > { %521 = vsyncadd (%p722_p0), [#allocation3], 4294967168  ;;  %383 = vmatprep.subr.bf16.mxu0 %v543_v0  ;;  %380 = vmatprep.mubr.msk.f32.mxu0 %vm544_vm0, %v545_v1  ;;  %s547_s27 = smov 127   ;;  %s548_s28 = smov 126   ;;  %vm187_vm1 = vcmask 1043456   ;;  %vm549_vm2 = vmmov 1  }
  0x35   : > { %s176_s11 = scalar_select %p175_p6, %s592_s16, 1  ;;  %444 = vset.pattern.permute.xlu1 %v546_v3  ;;  %445 = vset.pattern.permute.xlu0 %v546_v3  ;;  %vm385_vm3 = vmpackc.low %vm187_vm1, %vm549_vm2  ;;  %v189_v10 = vld [vmem:[#allocation2] sm:$0xff]  ;;  %vm196_vm4 = vcmask 97280   ;;  %vm272_vm5 = vcmask 113664  }
  0x36   : > { %193 = vperm.xlu1 %444, %v190_v4   ;;  %s172_s29 = sand.u32 1, %s532_s13   ;;  %s370_s4 = sshll.u32 %s592_s16, 7 }
  0x37   : > { %s366_s17 = sshll.u32 %s176_s11, 2  ;;  %s365_s30 = sshll.u32 %s172_s29, 3 }
  0x38   : > { %s178_s24 = scalar_lea.vmem %s709_s0, %s366_s17  ;;  %s174_s5 = scalar_lea.vmem [#allocation5], %s365_s30 }
  0x39   : > { %v179_v2 = vld [vmem:[%s178_s24] sm:$0xf]  ;;  %s288_s6 = sshll.u32 %s174_s5, 4  ;;  %s667_s9 = scalar_lea.hbm %s712_s3, %s370_s4  ;;  %s669_s6 = int_to_ptr.vmem [resolvable:$true] %s288_s6 }
  0x3a   : > { %v181_v5 = vrot.slane %v179_v2, 4  ;;  %s275_s10 = scalar_lea.sflag [#allocation4], %s172_s29  ;;  %s474_s11 = scalar_lea.vmem %s669_s6, 128 }
  0x3b   : > { %p475_p5 = scmp.ne.s32.totalorder %s669_s6, %s474_s11  ;;  %p723_p9 = scmp.ne.s32.totalorder %s716_s22, 0 }
  0x3c   : > { %182 = vrot.lane.b32.xlu0 %v181_v5, %s547_s27  ;;  %s550_s16 = smov [#allocation5]  }
  0x3d   : > { %p476_p10 = pnand %p475_p5, %p723_p9  ;;  %s478_s17 = sshll.u32 %s550_s16, 4  ;;  %s479_s17 = int_to_ptr.vmem [resolvable:$false] %s478_s17 }
  0x3e   : > { %s480_s19 = scalar_lea.vmem %s479_s17, 256  ;;  %p481_p2 = scmp.lt.s32.totalorder %s669_s6, %s479_s17 }
  0x3f   : > { %p477_p12 = pneg %p476_p10  ;;  %p482_p3 = scmp.lt.s32.totalorder %s480_s19, %s474_s11 }
  0x40   : > { %185 = vrot.lane.b32.xlu0 %v179_v2, %s548_s28 }
  0x41   : > { %p483_p4 = por %p482_p3, %p481_p2 }
  0x43   : > { %p484_p7 = pnand %p483_p4, %p477_p12 }
  0xae   : > { %v183_v6 = vpop.permute.xlu0 %182 }
  0xaf   : > { %v188_v7 = vsel %vm187_vm1, %v179_v2, %v183_v6 }
  0xb2   : > { %v186_v8 = vpop.permute.xlu0 %185 }
  0xb3   : > { %v384_v9 = vpack.c.bf16 %v186_v8, %v188_v7 }
  0xb5   : > { %386 = vmatpush3.bf16.msk.msra.mxu0 %vm385_vm3, %v384_v9  ;;  %v194_v11 = vpop.permute.xlu1 %193 }
  0xb8   : > { %381 = vmatmul.mubr.msk.f32.vlgmr.msra.gmra.mrb[0].mxu0 %vm196_vm4, %v189_v10 }
 0x18b   : > { %v268_v12 = vpop.f32.mrb[0].mxu0 }
 0x18c   : > { %v269_v13 = vadd.f32 %v268_v12, %v194_v11  ;;  %v382_v14 = vpop.f32.mrb[1].mxu0 }
 0x18e   : > { %273 = vst.msk [vmem:[%s174_s5] sm:$0xff] %vm272_vm5, %v269_v13 }
 0x18f   : > { %487 = shalt.err (!%p484_p7)
}
 0x190   : > { %s488_s20 = scalar_lea.hbm %s667_s9, 128  ;;  %s492_s26 = scalar_lea.hbm %s712_s3, 256 }
 0x191   : > { %p489_p8 = scmp.ne.s32.totalorder %s667_s9, %s488_s20  ;;  %p493_p1 = scmp.lt.u32.totalorder %s667_s9, %s712_s3 }
 0x192   : > { %p494_p0 = scmp.lt.u32.totalorder %s492_s26, %s488_s20  ;;  %p496_p5 = scmp.lt.u32.totalorder %s488_s20, %s667_s9 }
 0x193   : > { %p490_p11 = pnand %p489_p8, %p723_p9 }
 0x194   : > { %p495_p6 = por %p494_p0, %p493_p1 }
 0x195   : > { %p491_p13 = pneg %p490_p11 }
 0x196   : > { %p497_p10 = por %p496_p5, %p495_p6 }
 0x198   : > { %p498_p12 = pnand %p497_p10, %p491_p13 }
 0x19a   : > { %501 = shalt.err (!%p498_p12)
}
 0x19b   : > { %391 = dma.vmem_to_hbm [thread:$0]  (%p723_p9), %s669_s6, 128, %s667_s9, %s275_s10  }
 0x19c PF: > { %p403_p2 = scmp.ge.s32.totalorder %s540_s15, 2  ;;  %s300_s29 = sand.u32 1, %s528_s12  }
 0x19d   : > { %p724_p3 = scmp.ne.s32.totalorder %s717_s23, 0  ;;  %s301_s30 = scalar_lea.sflag [#allocation4], %s300_s29 }
 0x19f   : > { %p398_p4 = pnand %p403_p2, %p724_p3 }
 0x1a1   : > { %523 = dma.done.wait (!%p398_p4), %s301_s30, 128  }
 0x1a2   : > { %525 = vsyncadd (!%p398_p4), %s301_s30, 4294967168  ;;  %p14_p7 = scmp.ge.s32.totalorder %s596_s18, 4   ;;  %s725_s12 = smov %s532_s13 }
 0x1a3   : > { %s726_s13 = smov %s536_s14  ;;  %s727_s14 = smov %s607_s21 }
 0x1a4   : > { %s728_s15 = smov %s596_s18  ;;  %16 = sbr.rel (!%p14_p7) target bundleno = 4 (0x4), region = 72 }
 0x1ab   :  { %306 = vsyncpa [#allocation3], 1 }
 0x1ac   :  { %308 = vsyncpa [#allocation3 + $0x1], 1 }
 0x1ad   :  { %309 = vsyncpa [#allocation4], 1 }
 0x1ae   :  { %311 = vsyncpa [#allocation4 + $0x1], 1 }

</bundles_post_ra>
